<compile_context>
chip_gen: v6e
topology: v6e:2x2x1
jax: 0.10.0
libtpu: 0.0.40
codegen_flags: <defaults>
</compile_context>

<pallas_src>
import jax
import jax.numpy as jnp
from jax.experimental import pallas as pl
from jax.experimental.pallas import tpu as pltpu


def _round_up(n, m):
    return ((n + m - 1) // m) * m


def policy_kernel(x_ref, weff_ref, beff_ref, w2t_ref, b2_ref, wh_ref, bh_ref,
                  out_ref):
    # x block: (2, bb), batch along lanes.
    x = x_ref[...].astype(jnp.float32)

    # LayerNorm over the size-2 feature axis (pure VPU/EUP, lane-dense).
    # mean = (x0+x1)/2, dev = +/-d with d = (x0-x1)/2, biased var = d*d.
    d = 0.5 * (x[0:1, :] - x[1:2, :])                 # (1, bb)
    t = d * jax.lax.rsqrt(d * d + 1e-5)               # (1, bb)

    # LN affine + Linear(2,128) folded into one broadcast FMA:
    #   h1[f, b] = tanh(t[b] * w_eff[f] + b_eff[f])
    h1 = jnp.tanh(weff_ref[...] * t + beff_ref[...])  # (128, bb) f32

    # Linear(128,128) trunk on the MXU (f32 accumulation; operands follow the
    # resident weight dtype, bf16 by default).
    h2 = jnp.tanh(
        jnp.dot(w2t_ref[...], h1.astype(w2t_ref.dtype),
                preferred_element_type=jnp.float32) + b2_ref[...])  # (128, bb)

    # Fused heads (kept f32): (2,128) @ (128,bb) -> (2, bb).
    heads = jnp.dot(wh_ref[...], h2,
                    preferred_element_type=jnp.float32) + bh_ref[...]

    # Row-wise writeback: relu only on the std row, no iota/select mask.
    out_ref[0:1, :] = heads[0:1, :]
    out_ref[1:2, :] = jnp.maximum(heads[1:2, :], 0.0)


def prepare_params(p, *, trunk_dtype=jnp.bfloat16):
    """One-time host-side weight prep (LN fold, transpose, head fusion)."""
    hidden = p["w1"].shape[1]
    g = p["ln_g"].reshape(2)
    be = p["ln_b"].reshape(2)
    w1 = p["w1"]                                             # (2, hidden)
    # Fold LayerNorm affine into layer 1:
    #   xn0 =  t*g0 + be0, xn1 = -t*g1 + be1
    #   h1_pre = xn0*w1[0] + xn1*w1[1] + b1 = t*w_eff + b_eff
    w_eff = (g[0] * w1[0, :] - g[1] * w1[1, :]).reshape(hidden, 1)
    b_eff = (be[0] * w1[0, :] + be[1] * w1[1, :]
             + p["b1"].reshape(hidden)).reshape(hidden, 1)

    return {
        "w_eff": w_eff.astype(jnp.float32),                  # (128, 1)
        "b_eff": b_eff.astype(jnp.float32),                  # (128, 1)
        "w2t": p["w2"].T.astype(trunk_dtype),                # (128, 128) out,in
        "b2": p["b2"].reshape(hidden, 1).astype(jnp.float32),  # (128, 1)
        # Heads stay f32 (tiny) even with a bf16 trunk.
        "wh": jnp.concatenate([p["wm"], p["ws"]], axis=1).T.astype(jnp.float32),  # (2,128)
        "bh": jnp.concatenate([p["bm"], p["bs"]], axis=1).T.astype(jnp.float32),  # (2,1)
    }


def policy_forward(x, prep, *, block_b=4096):
    """x: (B, 2) -> (mean, std), each (B, 1) float32."""
    B = x.shape[0]
    xt = jnp.asarray(x, jnp.float32).T                       # (2, B) lane-dense

    # Batch tile: multiple of 128 lanes, capped at block_b; pad B so every
    # grid step sees a full block (padded columns discarded on the host).
    bb = _round_up(min(block_b, _round_up(B, 128)), 128)
    B_pad = _round_up(B, bb)
    if B_pad != B:
        xt = jnp.pad(xt, ((0, 0), (0, B_pad - B)))
    grid = (B_pad // bb,)

    weights = (prep["w_eff"], prep["b_eff"], prep["w2t"], prep["b2"],
               prep["wh"], prep["bh"])

    def resident(arr):  # whole array, VMEM-resident across all grid steps
        return pl.BlockSpec(arr.shape, lambda i: (0, 0))

    out = pl.pallas_call(
        policy_kernel,
        out_shape=jax.ShapeDtypeStruct((2, B_pad), jnp.float32),
        grid=grid,
        in_specs=[pl.BlockSpec((2, bb), lambda i: (0, i))]
                 + [resident(w) for w in weights],
        out_specs=pl.BlockSpec((2, bb), lambda i: (0, i)),
        compiler_params=pltpu.CompilerParams(
            dimension_semantics=("parallel",),
            vmem_limit_bytes=40 * 1024 * 1024),
    )(xt, *weights)

    mean = out[0, :B].reshape(B, 1)
    std = out[1, :B].reshape(B, 1)
    return mean, std


def init_params(key):
    ks = jax.random.split(key, 10)
    scale = 0.1
    # Linear weights stored as (in, out); biases as (1, out).
    return {
        "ln_g": 1.0 + scale * jax.random.normal(ks[8], (1, 2), jnp.float32),
        "ln_b": scale * jax.random.normal(ks[9], (1, 2), jnp.float32),
        "w1": scale * jax.random.normal(ks[0], (2, 128), jnp.float32),
        "b1": scale * jax.random.normal(ks[1], (1, 128), jnp.float32),
        "w2": scale * jax.random.normal(ks[2], (128, 128), jnp.float32),
        "b2": scale * jax.random.normal(ks[3], (1, 128), jnp.float32),
        "wm": scale * jax.random.normal(ks[4], (128, 1), jnp.float32),
        "bm": scale * jax.random.normal(ks[5], (1, 1), jnp.float32),
        "ws": scale * jax.random.normal(ks[6], (128, 1), jnp.float32),
        "bs": scale * jax.random.normal(ks[7], (1, 1), jnp.float32),
    }


def reference_forward(x, p):
    mu = jnp.mean(x, axis=-1, keepdims=True)
    var = jnp.mean((x - mu) ** 2, axis=-1, keepdims=True)
    xn = (x - mu) / jnp.sqrt(var + 1e-5) * p["ln_g"] + p["ln_b"]
    h1 = jnp.tanh(xn @ p["w1"] + p["b1"])
    h2 = jnp.tanh(h1 @ p["w2"] + p["b2"])
    mean = h2 @ p["wm"] + p["bm"]
    std = jnp.maximum(h2 @ p["ws"] + p["bs"], 0.0)
    return mean, std


if __name__ == "__main__":
    key = jax.random.PRNGKey(0)
    pkey, k1, k2, k3 = jax.random.split(key, 4)
    params = init_params(pkey)

    prep_f32 = prepare_params(params, trunk_dtype=jnp.float32)
    prep_bf16 = prepare_params(params)  # default bf16 trunk

    # Case 1: small batch, f32 trunk, single grid step.
    x = jax.random.normal(k1, (8, 2), jnp.float32)
    mean, std = policy_forward(x, prep_f32)
    jax.block_until_ready((mean, std))
    rm, rs = reference_forward(x, params)
    assert mean.shape == (8, 1) and std.shape == (8, 1)
    assert jnp.allclose(mean, rm, atol=1e-4, rtol=1e-4)
    assert jnp.allclose(std, rs, atol=1e-4, rtol=1e-4)

    # Case 2: ragged batch exercising multi-step grid + lane padding.
    x2 = jax.random.normal(k2, (300, 2), jnp.float32)
    m2, s2 = policy_forward(x2, prep_f32, block_b=128)
    jax.block_until_ready((m2, s2))
    rm2, rs2 = reference_forward(x2, params)
    assert m2.shape == (300, 1) and s2.shape == (300, 1)
    assert jnp.allclose(m2, rm2, atol=1e-4, rtol=1e-4)
    assert jnp.allclose(s2, rs2, atol=1e-4, rtol=1e-4)

    # Case 3: default bf16 trunk (MXU fast path), f32 accumulation + f32 heads.
    x3 = jax.random.normal(k3, (64, 2), jnp.float32)
    m3, s3 = policy_forward(x3, prep_bf16)
    jax.block_until_ready((m3, s3))
    rm3, rs3 = reference_forward(x3, params)
    assert jnp.allclose(m3, rm3, atol=5e-2, rtol=5e-2)
    assert jnp.allclose(s3, rs3, atol=5e-2, rtol=5e-2)

    print("KERNEL_OK")
</pallas_src>

<mosaic_0001>
module attributes {stable_mosaic.version = 11 : i64} {
  func.func @policy_kernel(%arg0: i32, %arg1: memref<2x128xf32, #tpu.memory_space<vmem>>, %arg2: memref<128x1xf32, #tpu.memory_space<vmem>>, %arg3: memref<128x1xf32, #tpu.memory_space<vmem>>, %arg4: memref<128x128xf32, #tpu.memory_space<vmem>>, %arg5: memref<128x1xf32, #tpu.memory_space<vmem>>, %arg6: memref<2x128xf32, #tpu.memory_space<vmem>>, %arg7: memref<2x1xf32, #tpu.memory_space<vmem>>, %arg8: memref<2x128xf32, #tpu.memory_space<vmem>>) attributes {dimension_semantics = [#tpu.dimension_semantics<parallel>], iteration_bounds = array<i64: 1>, scalar_prefetch = 0 : i64, scratch_operands = 0 : i64, tpu.core_type = #tpu.core_type<tc>, window_params = [{transform_indices = @transform_0, window_bounds = array<i64: 2, 128>}, {pipeline_mode = #tpu.pipeline_mode<synchronous>, transform_indices = @transform_1, window_bounds = array<i64: 128, 1>}, {pipeline_mode = #tpu.pipeline_mode<synchronous>, transform_indices = @transform_2, window_bounds = array<i64: 128, 1>}, {pipeline_mode = #tpu.pipeline_mode<synchronous>, transform_indices = @transform_3, window_bounds = array<i64: 128, 128>}, {pipeline_mode = #tpu.pipeline_mode<synchronous>, transform_indices = @transform_4, window_bounds = array<i64: 128, 1>}, {pipeline_mode = #tpu.pipeline_mode<synchronous>, transform_indices = @transform_5, window_bounds = array<i64: 2, 128>}, {pipeline_mode = #tpu.pipeline_mode<synchronous>, transform_indices = @transform_6, window_bounds = array<i64: 2, 1>}, {transform_indices = @transform_7, window_bounds = array<i64: 2, 128>}]} {
    %c0 = arith.constant 0 : index
    %c0_0 = arith.constant 0 : index
    %0 = vector.load %arg1[%c0, %c0_0] : memref<2x128xf32, #tpu.memory_space<vmem>>, vector<2x128xf32>
    %1 = vector.extract_strided_slice %0 {offsets = [0, 0], sizes = [1, 128], strides = [1, 1]} : vector<2x128xf32> to vector<1x128xf32>
    %2 = vector.extract_strided_slice %0 {offsets = [1, 0], sizes = [1, 128], strides = [1, 1]} : vector<2x128xf32> to vector<1x128xf32>
    %3 = arith.subf %1, %2 : vector<1x128xf32>
    %cst = arith.constant 5.000000e-01 : f32
    %4 = vector.broadcast %cst : f32 to vector<1x128xf32>
    %5 = arith.mulf %4, %3 : vector<1x128xf32>
    %6 = arith.mulf %5, %5 : vector<1x128xf32>
    %cst_1 = arith.constant 9.99999974E-6 : f32
    %7 = vector.broadcast %cst_1 : f32 to vector<1x128xf32>
    %8 = arith.addf %6, %7 : vector<1x128xf32>
    %9 = math.rsqrt %8 : vector<1x128xf32>
    %10 = arith.mulf %5, %9 : vector<1x128xf32>
    %c0_2 = arith.constant 0 : index
    %c0_3 = arith.constant 0 : index
    %11 = vector.load %arg2[%c0_2, %c0_3] : memref<128x1xf32, #tpu.memory_space<vmem>>, vector<128x1xf32>
    %12 = vector.broadcast %11 : vector<128x1xf32> to vector<128x128xf32>
    %13 = vector.broadcast %10 : vector<1x128xf32> to vector<128x128xf32>
    %14 = arith.mulf %12, %13 : vector<128x128xf32>
    %c0_4 = arith.constant 0 : index
    %c0_5 = arith.constant 0 : index
    %15 = vector.load %arg3[%c0_4, %c0_5] : memref<128x1xf32, #tpu.memory_space<vmem>>, vector<128x1xf32>
    %16 = vector.broadcast %15 : vector<128x1xf32> to vector<128x128xf32>
    %17 = arith.addf %14, %16 : vector<128x128xf32>
    %18 = math.tanh %17 : vector<128x128xf32>
    %c0_6 = arith.constant 0 : index
    %c0_7 = arith.constant 0 : index
    %19 = vector.load %arg4[%c0_6, %c0_7] : memref<128x128xf32, #tpu.memory_space<vmem>>, vector<128x128xf32>
    %cst_8 = arith.constant dense<0.000000e+00> : vector<128x128xf32>
    %20 = tpu.matmul %19, %18, %cst_8 {dimension_numbers = #tpu.dot_dimension_numbers<[1], [0], [0], [1], [0, 0, 1, 1], [], []>} : vector<128x128xf32>, vector<128x128xf32>, vector<128x128xf32> -> vector<128x128xf32>
    %c0_9 = arith.constant 0 : index
    %c0_10 = arith.constant 0 : index
    %21 = vector.load %arg5[%c0_9, %c0_10] : memref<128x1xf32, #tpu.memory_space<vmem>>, vector<128x1xf32>
    %22 = vector.broadcast %21 : vector<128x1xf32> to vector<128x128xf32>
    %23 = arith.addf %20, %22 : vector<128x128xf32>
    %24 = math.tanh %23 : vector<128x128xf32>
    %c0_11 = arith.constant 0 : index
    %c0_12 = arith.constant 0 : index
    %25 = vector.load %arg6[%c0_11, %c0_12] : memref<2x128xf32, #tpu.memory_space<vmem>>, vector<2x128xf32>
    %cst_13 = arith.constant dense<0.000000e+00> : vector<2x128xf32>
    %26 = tpu.matmul %25, %24, %cst_13 {dimension_numbers = #tpu.dot_dimension_numbers<[1], [0], [0], [1], [0, 0, 1, 1], [], []>} : vector<2x128xf32>, vector<128x128xf32>, vector<2x128xf32> -> vector<2x128xf32>
    %c0_14 = arith.constant 0 : index
    %c0_15 = arith.constant 0 : index
    %27 = vector.load %arg7[%c0_14, %c0_15] : memref<2x1xf32, #tpu.memory_space<vmem>>, vector<2x1xf32>
    %28 = vector.broadcast %27 : vector<2x1xf32> to vector<2x128xf32>
    %29 = arith.addf %26, %28 : vector<2x128xf32>
    %30 = vector.extract_strided_slice %29 {offsets = [0, 0], sizes = [1, 128], strides = [1, 1]} : vector<2x128xf32> to vector<1x128xf32>
    %c0_16 = arith.constant 0 : index
    %c0_17 = arith.constant 0 : index
    %31 = vector.load %arg8[%c0_16, %c0_17] : memref<2x128xf32, #tpu.memory_space<vmem>>, vector<1x128xf32>
    tpu.vector_store %arg8[%c0_16, %c0_17], %30 {strides = array<i32>} : memref<2x128xf32, #tpu.memory_space<vmem>>, vector<1x128xf32>,
    %32 = vector.extract_strided_slice %29 {offsets = [1, 0], sizes = [1, 128], strides = [1, 1]} : vector<2x128xf32> to vector<1x128xf32>
    %cst_18 = arith.constant 0.000000e+00 : f32
    %33 = vector.broadcast %cst_18 : f32 to vector<1x128xf32>
    %34 = arith.maximumf %32, %33 : vector<1x128xf32>
    %c1 = arith.constant 1 : index
    %c0_19 = arith.constant 0 : index
    %35 = vector.load %arg8[%c1, %c0_19] : memref<2x128xf32, #tpu.memory_space<vmem>>, vector<1x128xf32>
    tpu.vector_store %arg8[%c1, %c0_19], %34 {strides = array<i32>} : memref<2x128xf32, #tpu.memory_space<vmem>>, vector<1x128xf32>,
    return
  }
  func.func @transform_0(%arg0: i32) -> (i32, i32) {
    %c0_i32 = arith.constant 0 : i32
    %c0_i32_0 = arith.constant 0 : i32
    return %c0_i32, %arg0 : i32, i32
  }
  func.func @transform_1(%arg0: i32) -> (i32, i32) {
    %c0_i32 = arith.constant 0 : i32
    %c0_i32_0 = arith.constant 0 : i32
    %c0_i32_1 = arith.constant 0 : i32
    return %c0_i32, %c0_i32_0 : i32, i32
  }
  func.func @transform_2(%arg0: i32) -> (i32, i32) {
    %c0_i32 = arith.constant 0 : i32
    %c0_i32_0 = arith.constant 0 : i32
    %c0_i32_1 = arith.constant 0 : i32
    return %c0_i32, %c0_i32_0 : i32, i32
  }
  func.func @transform_3(%arg0: i32) -> (i32, i32) {
    %c0_i32 = arith.constant 0 : i32
    %c0_i32_0 = arith.constant 0 : i32
    %c0_i32_1 = arith.constant 0 : i32
    return %c0_i32, %c0_i32_0 : i32, i32
  }
  func.func @transform_4(%arg0: i32) -> (i32, i32) {
    %c0_i32 = arith.constant 0 : i32
    %c0_i32_0 = arith.constant 0 : i32
    %c0_i32_1 = arith.constant 0 : i32
    return %c0_i32, %c0_i32_0 : i32, i32
  }
  func.func @transform_5(%arg0: i32) -> (i32, i32) {
    %c0_i32 = arith.constant 0 : i32
    %c0_i32_0 = arith.constant 0 : i32
    %c0_i32_1 = arith.constant 0 : i32
    return %c0_i32, %c0_i32_0 : i32, i32
  }
  func.func @transform_6(%arg0: i32) -> (i32, i32) {
    %c0_i32 = arith.constant 0 : i32
    %c0_i32_0 = arith.constant 0 : i32
    %c0_i32_1 = arith.constant 0 : i32
    return %c0_i32, %c0_i32_0 : i32, i32
  }
  func.func @transform_7(%arg0: i32) -> (i32, i32) {
    %c0_i32 = arith.constant 0 : i32
    %c0_i32_0 = arith.constant 0 : i32
    return %c0_i32, %arg0 : i32, i32
  }
}

</mosaic_0001>

<bundles_post_ra>
// kernel: tpu_custom_call.1
= control target key start
LH: loop header
LB: loop body
LE: loop exit
PB: predicated region body
PF: predicated region fallthrough
CT: control target
= control target key end

     0   :  { %v882_v2 = vmov 0   ;;  %s1174_s0 = inlined_call_operand.vmem [shape: f32[2,128], index: 0, kind: input, shape index: {}]   ;;  %s1175_s1 = inlined_call_operand.vmem [shape: f32[128,1], index: 1, kind: input, shape index: {}]   ;;  %s1176_s2 = inlined_call_operand.vmem [shape: f32[128,1], index: 2, kind: input, shape index: {}]   ;;  %s1177_s3 = inlined_call_operand.vmem [shape: f32[128,128], index: 3, kind: input, shape index: {}]   ;;  %s1178_s4 = inlined_call_operand.vmem [shape: f32[128,1], index: 4, kind: input, shape index: {}]   ;;  %s1179_s5 = inlined_call_operand.vmem [shape: f32[2,128], index: 5, kind: input, shape index: {}]   ;;  %s1180_s6 = inlined_call_operand.vmem [shape: f32[2,1], index: 6, kind: input, shape index: {}]   ;;  %s1181_s7 = inlined_call_operand.hbm [shape: f32[2,128], index: 7, kind: output, shape index: {}]  }
   0x1   :  { %v168_v0 = vld [vmem:[%s1176_s2 + $0x78] sm:$0xff]  ;;  %793 = vset.pattern.permute.xlu1 %v882_v2  ;;  %792 = vset.pattern.permute.xlu0 %v882_v2  ;;  %v51_v3 = vld [vmem:[%s1175_s1 + $0x70] sm:$0xff]  ;;  %v50_v4 = vld [vmem:[%s1175_s1 + $0x68] sm:$0xff] }
   0x2   :  { %v52_v1 = vld [vmem:[%s1175_s1 + $0x78] sm:$0xff]  ;;  %246 = vperm.xlu1 %793, %v168_v0   ;;  %v167_v5 = vld [vmem:[%s1176_s2 + $0x70] sm:$0xff]  ;;  %v49_v6 = vld [vmem:[%s1175_s1 + $0x60] sm:$0xff] }
   0x3   :  { %130 = vperm.xlu0 %792, %v52_v1   ;;  %v166_v7 = vld [vmem:[%s1176_s2 + $0x68] sm:$0xff]  ;;  %v48_v8 = vld [vmem:[%s1175_s1 + $0x58] sm:$0xff]  ;;  %v165_v9 = vld [vmem:[%s1176_s2 + $0x60] sm:$0xff] }
   0x4   :  { %v47_v10 = vld [vmem:[%s1175_s1 + $0x50] sm:$0xff] }
   0x6   :  { %120 = vperm.xlu1 %793, %v50_v4  }
   0x7   :  { %125 = vperm.xlu0 %792, %v51_v3  }
   0xa   :  { %115 = vperm.xlu1 %793, %v49_v6  }
   0xb   :  { %241 = vperm.xlu0 %792, %v167_v5  }
   0xe   :  { %110 = vperm.xlu1 %793, %v48_v8  }
   0xf   :  { %236 = vperm.xlu0 %792, %v166_v7  }
  0x10   :  { %12 = vsyncpa [#allocation3], 0  ;;  %v164_v11 = vld [vmem:[%s1176_s2 + $0x58] sm:$0xff]  ;;  %v46_v12 = vld [vmem:[%s1175_s1 + $0x48] sm:$0xff]  ;;  %v133_v57 = vlaneseq  ;;  %vm884_vm0 = vmmov 0   ;;  %s885_s30 = smov [#allocation2]  }
  0x11   :  { %v163_v13 = vld [vmem:[%s1176_s2 + $0x50] sm:$0xff]  ;;  %v45_v14 = vld [vmem:[%s1175_s1 + $0x40] sm:$0xff]  ;;  %v162_v15 = vld [vmem:[%s1176_s2 + $0x48] sm:$0xff]  ;;  %s640_s8 = sshll.u32 %s885_s30, 4  ;;  %s641_s8 = int_to_ptr.vmem [resolvable:$true] %s640_s8 }
  0x12   :  { %105 = vperm.xlu1 %793, %v47_v10   ;;  %v44_v16 = vld [vmem:[%s1175_s1 + $0x38] sm:$0xff]  ;;  %v161_v17 = vld [vmem:[%s1176_s2 + $0x40] sm:$0xff]  ;;  %v43_v18 = vld [vmem:[%s1175_s1 + $0x30] sm:$0xff]  ;;  %v134_v58 = vshrl.u32 %v133_v57, 7  ;;  %s860_s9 = scalar_lea.vmem %s641_s8, 32  ;;  %p865_p1 = scmp.lt.s32.totalorder %s641_s8, %s641_s8 }
  0x13   :  { %231 = vperm.xlu0 %792, %v165_v9   ;;  %v160_v19 = vld [vmem:[%s1176_s2 + $0x38] sm:$0xff]  ;;  %v42_v20 = vld [vmem:[%s1175_s1 + $0x28] sm:$0xff]  ;;  %v159_v21 = vld [vmem:[%s1176_s2 + $0x30] sm:$0xff]  ;;  %p861_p0 = scmp.ne.s32.totalorder %s641_s8, %s860_s9  ;;  %p866_p2 = scmp.lt.s32.totalorder %s860_s9, %s860_s9 }
  0x14   :  { %v41_v22 = vld [vmem:[%s1175_s1 + $0x20] sm:$0xff]  ;;  %v158_v23 = vld [vmem:[%s1176_s2 + $0x28] sm:$0xff]  ;;  %v40_v24 = vld [vmem:[%s1175_s1 + $0x18] sm:$0xff]  ;;  %v135_v60 = vsub.s32 0, %v134_v58 }
  0x15   :  { %v157_v25 = vld [vmem:[%s1176_s2 + $0x20] sm:$0xff]  ;;  %v39_v26 = vld [vmem:[%s1175_s1 + $0x10] sm:$0xff]  ;;  %v156_v27 = vld [vmem:[%s1176_s2 + $0x18] sm:$0xff]  ;;  %p867_p3 = por %p866_p2, %p865_p1 }
  0x16   :  { %100 = vperm.xlu1 %793, %v46_v12   ;;  %v38_v28 = vld [vmem:[%s1175_s1 + $0x8] sm:$0xff]  ;;  %v155_v29 = vld [vmem:[%s1176_s2 + $0x10] sm:$0xff]  ;;  %v37_v30 = vld [vmem:[%s1175_s1] sm:$0xff] }
  0x17   :  { %226 = vperm.xlu0 %792, %v164_v11   ;;  %v154_v31 = vld [vmem:[%s1176_s2 + $0x8] sm:$0xff]  ;;  %v153_v32 = vld [vmem:[%s1176_s2] sm:$0xff]  ;;  %v312_v33 = vld [vmem:[%s1178_s4 + $0x78] sm:$0xff]  ;;  %p868_p4 = pnand %p867_p3, %p861_p0 }
  0x18   :  { %v311_v34 = vld [vmem:[%s1178_s4 + $0x70] sm:$0xff]  ;;  %v310_v35 = vld [vmem:[%s1178_s4 + $0x68] sm:$0xff]  ;;  %v309_v36 = vld [vmem:[%s1178_s4 + $0x60] sm:$0xff] }
  0x19   :  { %v308_v37 = vld [vmem:[%s1178_s4 + $0x58] sm:$0xff]  ;;  %v307_v38 = vld [vmem:[%s1178_s4 + $0x50] sm:$0xff]  ;;  %v306_v39 = vld [vmem:[%s1178_s4 + $0x48] sm:$0xff] }
  0x1a   :  { %95 = vperm.xlu1 %793, %v45_v14   ;;  %v305_v40 = vld [vmem:[%s1178_s4 + $0x40] sm:$0xff]  ;;  %v304_v42 = vld [vmem:[%s1178_s4 + $0x38] sm:$0xff]  ;;  %v303_v43 = vld [vmem:[%s1178_s4 + $0x30] sm:$0xff] }
  0x1b   :  { %221 = vperm.xlu0 %792, %v163_v13   ;;  %v281_v41 = vld [vmem:[%s1177_s3] sm:$0xff]  ;;  %v302_v46 = vld [vmem:[%s1178_s4 + $0x28] sm:$0xff]  ;;  %v300_v49 = vld [vmem:[%s1178_s4 + $0x18] sm:$0xff] }
  0x1c   :  { %729 = vmatprep.mubr.f32.mxu0 %v281_v41  ;;  %v27_v44 = vld [vmem:[%s1174_s0] sm:$0x3]  ;;  %v299_v50 = vld [vmem:[%s1178_s4 + $0x10] sm:$0xff]  ;;  %v298_v52 = vld [vmem:[%s1178_s4 + $0x8] sm:$0xff] }
  0x1d   :  { %v29_v45 = vrot.slane %v27_v44, 1  ;;  %v301_v47 = vld [vmem:[%s1178_s4 + $0x20] sm:$0xff] }
  0x1e   :  { %90 = vperm.xlu1 %793, %v44_v16   ;;  %v297_v53 = vld [vmem:[%s1178_s4] sm:$0xff] }
  0x1f   :  { %216 = vperm.xlu0 %792, %v162_v15   ;;  %v31_v48 = vsub.f32 %v27_v44, %v29_v45  ;;  %v555_v55 = vld [vmem:[%s1180_s6] sm:$0x3] }
  0x21   :  { %v32_v51 = vmul.f32 0.5, %v31_v48 }
  0x22   :  { %85 = vperm.xlu1 %793, %v43_v18  }
  0x23   :  { %211 = vperm.xlu0 %792, %v161_v17   ;;  %v33_v54 = vmul.f32 %v32_v51, %v32_v51 }
  0x25   :  { %v34_v56 = vadd.f32 1e-05, %v33_v54 }
  0x26   :  { %80 = vperm.xlu1 %793, %v42_v20  }
  0x27   :  { %206 = vperm.xlu0 %792, %v160_v19   ;;  %794 = vrsqrt.f32 %v34_v56 }
  0x2a   :  { %75 = vperm.xlu1 %793, %v41_v22  }
  0x2b   :  { %201 = vperm.xlu0 %792, %v159_v21  }
  0x2e   :  { %70 = vperm.xlu1 %793, %v40_v24  }
  0x2f   :  { %196 = vperm.xlu0 %792, %v158_v23  }
  0x32   :  { %65 = vperm.xlu1 %793, %v39_v26  }
  0x33   :  { %191 = vperm.xlu0 %792, %v157_v25  }
  0x34   :  { %v795_v59 = vpop.eup %794 }
  0x35   :  { %v36_v61 = vmul.f32 %v795_v59, %v32_v51 }
  0x36   :  { %60 = vperm.xlu1 %793, %v38_v28  }
  0x37   :  { %186 = vperm.xlu0 %792, %v156_v27   ;;  %v1079_v62 = vrot.slane %v36_v61, %v135_v60 }
  0x3a   :  { %55 = vperm.xlu1 %793, %v37_v30  }
  0x3b   :  { %181 = vperm.xlu0 %792, %v155_v29  }
  0x3e   :  { %171 = vperm.xlu1 %793, %v153_v32  }
  0x3f   :  { %176 = vperm.xlu0 %792, %v154_v31  }
  0x42   :  { %385 = vperm.xlu1 %793, %v311_v34  }
  0x43   :  { %390 = vperm.xlu0 %792, %v312_v33  }
  0x46   :  { %375 = vperm.xlu1 %793, %v309_v36  }
  0x47   :  { %380 = vperm.xlu0 %792, %v310_v35  }
  0x4a   :  { %365 = vperm.xlu1 %793, %v307_v38  }
  0x4b   :  { %370 = vperm.xlu0 %792, %v308_v37  }
  0x4e   :  { %355 = vperm.xlu1 %793, %v305_v40  }
  0x4f   :  { %360 = vperm.xlu0 %792, %v306_v39  }
  0x52   :  { %345 = vperm.xlu1 %793, %v303_v43  }
  0x53   :  { %350 = vperm.xlu0 %792, %v304_v42  }
  0x56   :  { %335 = vperm.xlu1 %793, %v301_v47  }
  0x57   :  { %340 = vperm.xlu0 %792, %v302_v46  }
  0x5a   :  { %325 = vperm.xlu1 %793, %v299_v50  }
  0x5b   :  { %330 = vperm.xlu0 %792, %v300_v49  }
  0x5e   :  { %315 = vperm.xlu1 %793, %v297_v53  }
  0x5f   :  { %320 = vperm.xlu0 %792, %v298_v52  }
  0x63   :  { %558 = vperm.xlu0 %792, %v555_v55  }
  0x7d   :  { %v247_v63 = vpop.permute.xlu1 %246 }
  0x7e   :  { %v131_v0 = vpop.permute.xlu0 %130 }
  0x7f   :  { %v152_v1 = vmul.f32 %v1079_v62, %v131_v0 }
  0x81   :  { %v264_v2 = vadd.f32 %v247_v63, %v152_v1  ;;  %v121_v4 = vpop.permute.xlu1 %120 }
  0x82   :  { %v126_v3 = vpop.permute.xlu0 %125  ;;  %v150_v9 = vmul.f32 %v1079_v62, %v121_v4 }
  0x83   :  { %796 = vtanh.f32 %v264_v2  ;;  %v151_v5 = vmul.f32 %v1079_v62, %v126_v3 }
  0x85   :  { %v116_v7 = vpop.permute.xlu1 %115 }
  0x86   :  { %v242_v6 = vpop.permute.xlu0 %241  ;;  %v149_v13 = vmul.f32 %v1079_v62, %v116_v7 }
  0x87   :  { %v263_v8 = vadd.f32 %v242_v6, %v151_v5 }
  0x89   :  { %798 = vtanh.f32 %v263_v8  ;;  %v111_v11 = vpop.permute.xlu1 %110 }
  0x8a   :  { %v237_v10 = vpop.permute.xlu0 %236  ;;  %v148_v18 = vmul.f32 %v1079_v62, %v111_v11 }
  0x8b   :  { %v262_v12 = vadd.f32 %v237_v10, %v150_v9 }
  0x8d   :  { %800 = vtanh.f32 %v262_v12  ;;  %v106_v15 = vpop.permute.xlu1 %105 }
  0x8e   :  { %v232_v14 = vpop.permute.xlu0 %231  ;;  %v147_v22 = vmul.f32 %v1079_v62, %v106_v15  ;;  %v282_v15 = vld [vmem:[%s1177_s3 + $0x8] sm:$0xff] }
  0x8f   :  { %v261_v16 = vadd.f32 %v232_v14, %v149_v13 }
  0x90   :  { %v797_v17 = vpop.eup %796 }
  0x91   :  { %802 = vtanh.f32 %v261_v16  ;;  %697 = vmatprep.subr.mxu0 %v797_v17  ;;  %v101_v20 = vpop.permute.xlu1 %100  ;;  %v283_v16 = vld [vmem:[%s1177_s3 + $0x10] sm:$0xff] }
  0x92   :  { %v227_v19 = vpop.permute.xlu0 %226  ;;  %698 = vmatpush3.msra.mxu0 %v797_v17  ;;  %v146_v27 = vmul.f32 %v1079_v62, %v101_v20  ;;  %v284_v17 = vld [vmem:[%s1177_s3 + $0x18] sm:$0xff]  ;;  %v287_v20 = vld [vmem:[%s1177_s3 + $0x30] sm:$0xff] }
  0x93   :  { %v260_v21 = vadd.f32 %v227_v19, %v148_v18  ;;  %v285_v18 = vld [vmem:[%s1177_s3 + $0x20] sm:$0xff]  ;;  %v286_v19 = vld [vmem:[%s1177_s3 + $0x28] sm:$0xff] }
  0x95   :  { %804 = vtanh.f32 %v260_v21  ;;  %v96_v25 = vpop.permute.xlu1 %95  ;;  %v288_v21 = vld [vmem:[%s1177_s3 + $0x38] sm:$0xff] }
  0x96   :  { %v799_v23 = vpop.eup %798  ;;  %v222_v24 = vpop.permute.xlu0 %221  ;;  %v145_v32 = vmul.f32 %v1079_v62, %v96_v25  ;;  %v292_v25 = vld [vmem:[%s1177_s3 + $0x58] sm:$0xff] }
  0x97   :  { %v259_v26 = vadd.f32 %v222_v24, %v147_v22  ;;  %699 = vmatprep.subr.mxu0 %v799_v23  ;;  %v289_v22 = vld [vmem:[%s1177_s3 + $0x40] sm:$0xff]  ;;  %v291_v24 = vld [vmem:[%s1177_s3 + $0x50] sm:$0xff] }
  0x98   :  { %700 = vmatpush3.msra.mxu0 %v799_v23  ;;  %v290_v23 = vld [vmem:[%s1177_s3 + $0x48] sm:$0xff] }
  0x99   :  { %806 = vtanh.f32 %v259_v26  ;;  %v91_v30 = vpop.permute.xlu1 %90  ;;  %v293_v26 = vld [vmem:[%s1177_s3 + $0x60] sm:$0xff] }
  0x9a   :  { %v801_v28 = vpop.eup %800  ;;  %v217_v29 = vpop.permute.xlu0 %216  ;;  %v144_v37 = vmul.f32 %v1079_v62, %v91_v30  ;;  %v883_v30 = vmov 0.0  }
  0x9b   :  { %v258_v31 = vadd.f32 %v217_v29, %v146_v27  ;;  %701 = vmatprep.subr.mxu0 %v801_v28  ;;  %v294_v27 = vld [vmem:[%s1177_s3 + $0x68] sm:$0xff]  ;;  %v296_v29 = vld [vmem:[%s1177_s3 + $0x78] sm:$0xff]  ;;  %753 = vmatprep.subr.mxu1 %v883_v30 }
  0x9c   :  { %702 = vmatpush3.msra.mxu0 %v801_v28  ;;  %v295_v28 = vld [vmem:[%s1177_s3 + $0x70] sm:$0xff]  ;;  %785 = vmatprep.mubr.msk.f32.mxu1 %vm884_vm0, %v883_v30 }
  0x9d   :  { %808 = vtanh.f32 %v258_v31  ;;  %v86_v35 = vpop.permute.xlu1 %85 }
  0x9e   :  { %v803_v33 = vpop.eup %802  ;;  %v212_v34 = vpop.permute.xlu0 %211  ;;  %v143_v42 = vmul.f32 %v1079_v62, %v86_v35 }
  0x9f   :  { %v257_v36 = vadd.f32 %v212_v34, %v145_v32  ;;  %703 = vmatprep.subr.mxu0 %v803_v33 }
  0xa0   :  { %704 = vmatpush3.msra.mxu0 %v803_v33 }
  0xa1   :  { %810 = vtanh.f32 %v257_v36  ;;  %v81_v40 = vpop.permute.xlu1 %80 }
  0xa2   :  { %v805_v38 = vpop.eup %804  ;;  %v207_v39 = vpop.permute.xlu0 %206  ;;  %v142_v47 = vmul.f32 %v1079_v62, %v81_v40 }
  0xa3   :  { %v256_v41 = vadd.f32 %v207_v39, %v144_v37  ;;  %705 = vmatprep.subr.mxu0 %v805_v38 }
  0xa4   :  { %706 = vmatpush3.msra.mxu0 %v805_v38 }
  0xa5   :  { %812 = vtanh.f32 %v256_v41  ;;  %v76_v45 = vpop.permute.xlu1 %75 }
  0xa6   :  { %v807_v43 = vpop.eup %806  ;;  %v202_v44 = vpop.permute.xlu0 %201  ;;  %v141_v52 = vmul.f32 %v1079_v62, %v76_v45 }
  0xa7   :  { %v255_v46 = vadd.f32 %v202_v44, %v143_v42  ;;  %707 = vmatprep.subr.mxu0 %v807_v43 }
  0xa8   :  { %708 = vmatpush3.msra.mxu0 %v807_v43 }
  0xa9   :  { %814 = vtanh.f32 %v255_v46  ;;  %v71_v50 = vpop.permute.xlu1 %70 }
  0xaa   :  { %v809_v48 = vpop.eup %808  ;;  %v197_v49 = vpop.permute.xlu0 %196  ;;  %v140_v57 = vmul.f32 %v1079_v62, %v71_v50 }
  0xab   :  { %v254_v51 = vadd.f32 %v197_v49, %v142_v47  ;;  %709 = vmatprep.subr.mxu0 %v809_v48 }
  0xac   :  { %710 = vmatpush3.msra.mxu0 %v809_v48 }
  0xad   :  { %816 = vtanh.f32 %v254_v51  ;;  %v66_v55 = vpop.permute.xlu1 %65 }
  0xae   :  { %v811_v53 = vpop.eup %810  ;;  %v192_v54 = vpop.permute.xlu0 %191  ;;  %v139_v63 = vmul.f32 %v1079_v62, %v66_v55 }
  0xaf   :  { %v253_v56 = vadd.f32 %v192_v54, %v141_v52  ;;  %711 = vmatprep.subr.mxu0 %v811_v53 }
  0xb0   :  { %712 = vmatpush3.msra.mxu0 %v811_v53 }
  0xb1   :  { %818 = vtanh.f32 %v253_v56  ;;  %v61_v60 = vpop.permute.xlu1 %60 }
  0xb2   :  { %v813_v58 = vpop.eup %812  ;;  %v187_v59 = vpop.permute.xlu0 %186  ;;  %v138_v4 = vmul.f32 %v1079_v62, %v61_v60 }
  0xb3   :  { %v252_v61 = vadd.f32 %v187_v59, %v140_v57  ;;  %713 = vmatprep.subr.mxu0 %v813_v58 }
  0xb4   :  { %714 = vmatpush3.msra.mxu0 %v813_v58 }
  0xb5   :  { %820 = vtanh.f32 %v252_v61  ;;  %v56_v2 = vpop.permute.xlu1 %55 }
  0xb6   :  { %v815_v0 = vpop.eup %814  ;;  %v182_v1 = vpop.permute.xlu0 %181  ;;  %v137_v5 = vmul.f32 %v1079_v62, %v56_v2 }
  0xb7   :  { %v251_v3 = vadd.f32 %v182_v1, %v139_v63  ;;  %715 = vmatprep.subr.mxu0 %v815_v0 }
  0xb8   :  { %716 = vmatpush3.msra.mxu0 %v815_v0 }
  0xb9   :  { %822 = vtanh.f32 %v251_v3  ;;  %v172_v8 = vpop.permute.xlu1 %171 }
  0xba   :  { %v817_v6 = vpop.eup %816  ;;  %v177_v7 = vpop.permute.xlu0 %176  ;;  %v249_v10 = vadd.f32 %v172_v8, %v137_v5 }
  0xbb   :  { %v250_v9 = vadd.f32 %v177_v7, %v138_v4  ;;  %717 = vmatprep.subr.mxu0 %v817_v6 }
  0xbc   :  { %718 = vmatpush3.msra.mxu0 %v817_v6 }
  0xbd   :  { %824 = vtanh.f32 %v250_v9  ;;  %v386_v39 = vpop.permute.xlu1 %385 }
  0xbe   :  { %v819_v11 = vpop.eup %818  ;;  %826 = vtanh.f32 %v249_v10  ;;  %v391_v37 = vpop.permute.xlu0 %390 }
  0xbf   :  { %719 = vmatprep.subr.mxu0 %v819_v11 }
  0xc0   :  { %720 = vmatpush3.msra.mxu0 %v819_v11 }
  0xc1   :  { %v376_v44 = vpop.permute.xlu1 %375 }
  0xc2   :  { %v821_v12 = vpop.eup %820  ;;  %v381_v42 = vpop.permute.xlu0 %380 }
  0xc3   :  { %721 = vmatprep.subr.mxu0 %v821_v12 }
  0xc4   :  { %722 = vmatpush3.msra.mxu0 %v821_v12 }
  0xc5   :  { %v366_v49 = vpop.permute.xlu1 %365 }
  0xc6   :  { %v823_v13 = vpop.eup %822  ;;  %v371_v47 = vpop.permute.xlu0 %370 }
  0xc7   :  { %723 = vmatprep.subr.mxu0 %v823_v13 }
  0xc8   :  { %724 = vmatpush3.msra.mxu0 %v823_v13 }
  0xc9   :  { %v356_v57 = vpop.permute.xlu1 %355 }
  0xca   :  { %v825_v14 = vpop.eup %824  ;;  %v361_v53 = vpop.permute.xlu0 %360 }
  0xcb   :  { %725 = vmatprep.subr.mxu0 %v825_v14  ;;  %v827_v62 = vpop.eup %826 }
  0xcc   :  { %726 = vmatpush3.msra.mxu0 %v825_v14 }
  0xcd   :  { %727 = vmatprep.subr.mxu0 %v827_v62  ;;  %v346_v63 = vpop.permute.xlu1 %345 }
  0xce   :  { %728 = vmatpush3.msra.mxu0 %v827_v62  ;;  %v351_v60 = vpop.permute.xlu0 %350 }
  0xcf   :  { %730 = vmatmul.mubr.f32.vlgmr.msra.gmra.mxu0 %v282_v15 }
  0xd0   :  { %732 = vmatprep.mubr.f32.mxu0 %v283_v16 }
  0xd1   :  { %v336_v5 = vpop.permute.xlu1 %335 }
  0xd2   :  { %v341_v2 = vpop.permute.xlu0 %340 }
  0xd3   :  { %733 = vmatmul.mubr.f32.gmra.mxu0 %v284_v17 }
  0xd4   :  { %735 = vmatprep.mubr.f32.mxu0 %v285_v18 }
  0xd5   :  { %v326_v13 = vpop.permute.xlu1 %325 }
  0xd6   :  { %v331_v10 = vpop.permute.xlu0 %330 }
  0xd7   :  { %736 = vmatmul.mubr.f32.gmra.mxu0 %v286_v19 }
  0xd8   :  { %738 = vmatprep.mubr.f32.mxu0 %v287_v20 }
  0xd9   :  { %v316_v20 = vpop.permute.xlu1 %315 }
  0xda   :  { %v321_v17 = vpop.permute.xlu0 %320 }
  0xdb   :  { %739 = vmatmul.mubr.f32.gmra.mxu0 %v288_v21 }
  0xdc   :  { %741 = vmatprep.mubr.f32.mxu0 %v289_v22 }
  0xdf   :  { %742 = vmatmul.mubr.f32.gmra.mxu0 %v290_v23 }
  0xe0   :  { %744 = vmatprep.mubr.f32.mxu0 %v291_v24 }
  0xe3   :  { %745 = vmatmul.mubr.f32.gmra.mxu0 %v292_v25 }
  0xe4   :  { %747 = vmatprep.mubr.f32.mxu0 %v293_v26 }
  0xe7   :  { %748 = vmatmul.mubr.f32.gmra.mxu0 %v294_v27 }
  0xe8   :  { %750 = vmatprep.mubr.f32.mxu0 %v295_v28 }
  0xeb   :  { %751 = vmatmul.mubr.f32.gmra.mxu0 %v296_v29 }
 0x18f   :  { %v1144_v31 = vpop.f32.mrf.mxu0 }
 0x190   :  { %v465_v18 = vadd.f32 %v1144_v31, %v321_v17  ;;  %v554_v31 = vld [vmem:[%s1179_s5] sm:$0x3] }
 0x191   :  { %v1146_v32 = vpop.f32.mrf.mxu0 }
 0x192   :  { %v460_v21 = vadd.f32 %v1146_v32, %v316_v20 }
 0x193   :  { %v734_v33 = vpop.f32.mrf.mxu0 }
 0x194   :  { %v475_v14 = vadd.f32 %v734_v33, %v331_v10  ;;  %v559_v33 = vpop.permute.xlu0 %558 }
 0x195   :  { %v1148_v34 = vpop.f32.mrf.mxu0 }
 0x196   :  { %v470_v15 = vadd.f32 %v1148_v34, %v326_v13 }
 0x197   :  { %v737_v35 = vpop.f32.mrf.mxu0 }
 0x198   :  { %v485_v8 = vadd.f32 %v737_v35, %v341_v2 }
 0x199   :  { %v479_v36 = vpop.f32.mrf.mxu0 }
 0x19a   :  { %v480_v11 = vadd.f32 %v479_v36, %v336_v5 }
 0x19b   :  { %v740_v38 = vpop.f32.mrf.mxu0 }
 0x19c   :  { %v495_v3 = vadd.f32 %v740_v38, %v351_v60 }
 0x19d   :  { %v489_v40 = vpop.f32.mrf.mxu0 }
 0x19e   :  { %v490_v6 = vadd.f32 %v489_v40, %v346_v63 }
 0x19f   :  { %v743_v41 = vpop.f32.mrf.mxu0 }
 0x1a0   :  { %v505_v0 = vadd.f32 %v743_v41, %v361_v53 }
 0x1a1   :  { %v499_v43 = vpop.f32.mrf.mxu0 }
 0x1a2   :  { %v500_v1 = vadd.f32 %v499_v43, %v356_v57 }
 0x1a3   :  { %v746_v45 = vpop.f32.mrf.mxu0 }
 0x1a4   :  { %v515_v59 = vadd.f32 %v746_v45, %v371_v47 }
 0x1a5   :  { %v509_v46 = vpop.f32.mrf.mxu0 }
 0x1a6   :  { %v510_v61 = vadd.f32 %v509_v46, %v366_v49 }
 0x1a7   :  { %v749_v48 = vpop.f32.mrf.mxu0 }
 0x1a8   :  { %v525_v55 = vadd.f32 %v749_v48, %v381_v42 }
 0x1a9   :  { %v519_v50 = vpop.f32.mrf.mxu0 }
 0x1aa   :  { %v520_v58 = vadd.f32 %v519_v50, %v376_v44 }
 0x1ab   :  { %v752_v51 = vpop.f32.mrf.mxu0 }
 0x1ac   :  { %v535_v52 = vadd.f32 %v752_v51, %v391_v37 }
 0x1ad   :  { %v529_v54 = vpop.f32.mrf.mxu0 }
 0x1ae   :  { %828 = vtanh.f32 %v535_v52  ;;  %v530_v56 = vadd.f32 %v529_v54, %v386_v39 }
 0x1b0   :  { %830 = vtanh.f32 %v530_v56 }
 0x1b1   :  { %832 = vtanh.f32 %v525_v55 }
 0x1b2   :  { %834 = vtanh.f32 %v520_v58 }
 0x1b3   :  { %836 = vtanh.f32 %v515_v59 }
 0x1b4   :  { %838 = vtanh.f32 %v510_v61 }
 0x1b5   :  { %840 = vtanh.f32 %v505_v0 }
 0x1b6   :  { %842 = vtanh.f32 %v500_v1 }
 0x1b7   :  { %844 = vtanh.f32 %v495_v3 }
 0x1b8   :  { %846 = vtanh.f32 %v490_v6 }
 0x1b9   :  { %848 = vtanh.f32 %v485_v8 }
 0x1ba   :  { %850 = vtanh.f32 %v480_v11 }
 0x1bb   :  { %v829_v4 = vpop.eup %828  ;;  %852 = vtanh.f32 %v475_v14 }
 0x1bc   :  { %754 = vmatpush3.msra.mxu1 %v829_v4  ;;  %854 = vtanh.f32 %v470_v15 }
 0x1bd   :  { %v831_v7 = vpop.eup %830  ;;  %755 = vmatprep.subr.mxu1 %v883_v30  ;;  %856 = vtanh.f32 %v465_v18 }
 0x1be   :  { %756 = vmatpush3.msra.mxu1 %v831_v7  ;;  %v833_v9 = vpop.eup %832  ;;  %858 = vtanh.f32 %v460_v21 }
 0x1bf   :  { %757 = vmatprep.subr.mxu1 %v883_v30  ;;  %v835_v12 = vpop.eup %834 }
 0x1c0   :  { %758 = vmatpush3.msra.mxu1 %v833_v9  ;;  %v837_v62 = vpop.eup %836 }
 0x1c1   :  { %759 = vmatprep.subr.mxu1 %v883_v30  ;;  %v839_v16 = vpop.eup %838 }
 0x1c2   :  { %760 = vmatpush3.msra.mxu1 %v835_v12  ;;  %v841_v19 = vpop.eup %840 }
 0x1c3   :  { %761 = vmatprep.subr.mxu1 %v883_v30  ;;  %v843_v22 = vpop.eup %842 }
 0x1c4   :  { %762 = vmatpush3.msra.mxu1 %v837_v62  ;;  %v845_v23 = vpop.eup %844 }
 0x1c5   :  { %763 = vmatprep.subr.mxu1 %v883_v30  ;;  %v847_v24 = vpop.eup %846 }
 0x1c6   :  { %764 = vmatpush3.msra.mxu1 %v839_v16  ;;  %v849_v25 = vpop.eup %848 }
 0x1c7   :  { %765 = vmatprep.subr.mxu1 %v883_v30  ;;  %v851_v26 = vpop.eup %850 }
 0x1c8   :  { %766 = vmatpush3.msra.mxu1 %v841_v19  ;;  %v853_v27 = vpop.eup %852 }
 0x1c9   :  { %767 = vmatprep.subr.mxu1 %v883_v30  ;;  %v855_v28 = vpop.eup %854 }
 0x1ca   :  { %768 = vmatpush3.msra.mxu1 %v843_v22  ;;  %v857_v29 = vpop.eup %856 }
 0x1cb   :  { %769 = vmatprep.subr.mxu1 %v883_v30  ;;  %v859_v32 = vpop.eup %858 }
 0x1cc   :  { %770 = vmatpush3.msra.mxu1 %v845_v23 }
 0x1cd   :  { %771 = vmatprep.subr.mxu1 %v883_v30 }
 0x1ce   :  { %772 = vmatpush3.msra.mxu1 %v847_v24 }
 0x1cf   :  { %773 = vmatprep.subr.mxu1 %v883_v30 }
 0x1d0   :  { %774 = vmatpush3.msra.mxu1 %v849_v25 }
 0x1d1   :  { %775 = vmatprep.subr.mxu1 %v883_v30 }
 0x1d2   :  { %776 = vmatpush3.msra.mxu1 %v851_v26 }
 0x1d3   :  { %777 = vmatprep.subr.mxu1 %v883_v30 }
 0x1d4   :  { %778 = vmatpush3.msra.mxu1 %v853_v27 }
 0x1d5   :  { %779 = vmatprep.subr.mxu1 %v883_v30 }
 0x1d6   :  { %780 = vmatpush3.msra.mxu1 %v855_v28 }
 0x1d7   :  { %781 = vmatprep.subr.mxu1 %v883_v30 }
 0x1d8   :  { %782 = vmatpush3.msra.mxu1 %v857_v29 }
 0x1d9   :  { %783 = vmatprep.subr.mxu1 %v883_v30 }
 0x1da   :  { %784 = vmatpush3.msra.mxu1 %v859_v32 }
 0x1db   :  { %786 = vmatmul.mubr.f32.vlgmr.msra.gmra.mxu1 %v554_v31 }
 0x29b   :  { %v627_v34 = vpop.f32.mrf.mxu1 }
 0x29c   :  { %v628_v35 = vadd.f32 %v627_v34, %v559_v33 }
 0x29d   :  { %v787_v36 = vpop.f32.mrf.mxu1 }
 0x29e   :  { %631 = vst [vmem:[#allocation2] sm:$0x1] %v628_v35  ;;  %v632_v37 = vmax.f32 %v628_v35, 0.0 }
 0x2a0   :  { %633 = vst [vmem:[#allocation2] sm:$0x2] %v632_v37 }
 0x2a1   :  { %871 = shalt.err (!%p868_p4)
}
 0x2a2   :  { %643 = dma.vmem_to_hbm [thread:$0]  %s641_s8, 32, %s1181_s7, [#allocation3]  }
 0x2a3   :  { %880 = dma.done.wait [#allocation3], 32  }
 0x2a4   :  { %881 = vsyncadd [#allocation3], 4294967264 }
 0x2a5   :  { %647 = vsyncpa [#allocation3], 1 }

</bundles_post_ra>
